<compile_context>
chip_gen: v6e
topology: v6e:2x2x1
jax: 0.10.0
libtpu: 0.0.40
codegen_flags: <defaults>
</compile_context>

<pallas_src>
import functools

import jax
import jax.numpy as jnp
from jax.experimental import pallas as pl
from jax.experimental.pallas import tpu as pltpu


# ---------------------------------------------------------------------------
# Kernel
# ---------------------------------------------------------------------------
def _fused_heads_kernel(x_img_ref, x_aud_ref, x_mm_ref, w_ref, b_ref, o_ref,
                        acc_ref, *, seq_lens, seq_tiles, n_tiles):
    """grid = (head, batch_tile, seq_tile); seq (the reduction) is innermost.

    For each (head, batch_tile) the kernel accumulates a float32 token sum in
    `acc_ref` across that head's sequence tiles (cdiv tail tiles are masked),
    then on the last grid step applies the head's classifier:
        out = token_sum @ (W^T / S)_pad + bias_pad      (1/S folded into W)
    Only the active head's activation ref is touched (pl.when gated); the
    other two stay parked in VMEM so no redundant HBM streaming happens.
    """
    h = pl.program_id(0)
    s = pl.program_id(2)

    @pl.when(s == 0)
    def _init():
        acc_ref[...] = jnp.zeros_like(acc_ref)

    def _accumulate(head_idx, x_ref):
        seq_len = seq_lens[head_idx]
        tile = seq_tiles[head_idx]
        nt = n_tiles[head_idx]

        @pl.when(jnp.logical_and(h == head_idx, s < nt))
        def _():
            # NOTE(bf16): the f32 cast is fused vreg-by-vreg into the reduce;
            # the kernel is HBM-streaming-bound so the VPU has ample slack.
            x = x_ref[...].astype(jnp.float32)
            if seq_len % tile != 0:
                # cdiv tail tile: zero the padded token rows so they do not
                # perturb the sum (1/seq_len is pre-folded into the weights).
                row = jax.lax.broadcasted_iota(
                    jnp.int32, (tile, x.shape[-1]), 0)
                x = jnp.where(row < (seq_len - s * tile), x, 0.0)
            acc_ref[...] += jnp.sum(x, axis=1)

    _accumulate(0, x_img_ref)
    _accumulate(1, x_aud_ref)
    _accumulate(2, x_mm_ref)

    @pl.when(s == pl.num_programs(2) - 1)
    def _finalize():
        # Lane-dense padded output -> unmasked vst; 1/S already in w_ref.
        o_ref[...] = (
            jnp.dot(acc_ref[...], w_ref[...],
                    preferred_element_type=jnp.float32)
            + b_ref[...])


# ---------------------------------------------------------------------------
# Parameter prep (call once per model config; reuse across forward passes)
# ---------------------------------------------------------------------------
def prepare_fused_head_params(weights, biases, seq_lens):
    """Pad the three nn.Linear heads into stacked, lane-dense, mean-folded
    parameters.

    weights : 3 arrays of shape [C, H] (PyTorch nn.Linear layout)
    biases  : 3 arrays of shape [C]
    seq_lens: per-head sequence length (1/S is folded into the weights so the
              kernel never multiplies by inv_len).
    Returns (w_stack [3, H, C_pad], b_stack [3, 1, C_pad], num_classes).
    """
    C, H = weights[0].shape
    c_pad = max(128, ((C + 127) // 128) * 128)
    w_stack = jnp.zeros((3, H, c_pad), jnp.float32)
    b_stack = jnp.zeros((3, 1, c_pad), jnp.float32)
    for i, (w, b, s_len) in enumerate(zip(weights, biases, seq_lens)):
        w_stack = w_stack.at[i, :, :C].set(
            w.T.astype(jnp.float32) * (1.0 / float(s_len)))
        b_stack = b_stack.at[i, :, :C].set(b.astype(jnp.float32))
    return w_stack, b_stack, C


# ---------------------------------------------------------------------------
# Tiling helpers
# ---------------------------------------------------------------------------
def _sublane_align(dtype):
    # f32 -> 8, bf16 -> 16, int8/fp8 -> 32 (packed dtypes pack along sublanes)
    itemsize = jnp.dtype(dtype).itemsize
    return max(8, 8 * (4 // max(1, itemsize)))


def _round_down(x, m):
    return (x // m) * m


# ---------------------------------------------------------------------------
# Fused wrapper
# ---------------------------------------------------------------------------
def early_fusion_heads_av(x_image, x_audio, x_mm, w_stack, b_stack,
                          num_classes, *, block_b=None, block_s=None,
                          input_buffer_budget_bytes=2 * 1024 * 1024,
                          vmem_limit_bytes=32 * 1024 * 1024):
    """x_*: [B, S_head, H] backbone hidden states (S may differ per head).
    w_stack/b_stack: from prepare_fused_head_params.
    Returns (logits_image, logits_audio, logits_mm), each float32 [B, C]."""
    xs = (x_image, x_audio, x_mm)
    B, _, H = x_image.shape
    assert x_audio.shape[0] == B and x_mm.shape[0] == B
    assert x_audio.shape[2] == H and x_mm.shape[2] == H
    seq_lens = tuple(int(x.shape[1]) for x in xs)
    c_pad = w_stack.shape[-1]

    # ---- batch tile: 8-aligned, up to 128; cdiv tail rows are masked on the
    # output store, so no divisibility requirement on B. ----
    if block_b is not None:
        assert 0 < block_b <= B and (block_b == B or block_b % 8 == 0), (
            f"block_b={block_b} must be B or an 8-aligned value <= B={B}")
        bt = block_b
    elif B <= 8:
        bt = B
    else:
        bt = min(_round_down(B, 8), 128)

    # ---- per-head sequence tile: dtype-aware sublane alignment + VMEM budget;
    # cdiv tail tokens are masked in-kernel, so no divisibility requirement. ----
    def seq_tile(s_len, dtype, bt_):
        align = _sublane_align(dtype)
        if block_s is not None:
            if block_s >= s_len:
                return s_len
            assert block_s % align == 0, (
                f"block_s={block_s} must be a multiple of {align} for {dtype}")
            return block_s
        if s_len <= align:
            return s_len
        itemsize = jnp.dtype(dtype).itemsize
        target = input_buffer_budget_bytes // max(1, itemsize * bt_ * H)
        return max(align, _round_down(min(s_len, max(align, target)), align))

    while True:
        sts = tuple(seq_tile(s, x.dtype, bt) for s, x in zip(seq_lens, xs))
        vmem_bytes = sum(2 * bt * st * H * jnp.dtype(x.dtype).itemsize
                         for st, x in zip(sts, xs))          # x double-buffers
        vmem_bytes += 2 * (H * c_pad + c_pad + bt * c_pad) * 4  # w, b, out
        vmem_bytes += bt * H * 4                                # accumulator
        if (block_b is not None or bt == B or bt <= 8
                or vmem_bytes <= (3 * vmem_limit_bytes) // 4):
            break
        bt = max(8, _round_down(bt // 2, 8))   # shrink bt until it fits

    n_tiles = tuple(pl.cdiv(s, st) for s, st in zip(seq_lens, sts))
    max_nt = max(n_tiles)
    grid = (3, pl.cdiv(B, bt), max_nt)

    def x_spec(head_idx, st, nt):
        def index_map(h, b, s):
            active = h == head_idx
            # Non-active heads park at block (0, 0, 0): the block index stays
            # constant, so the pipeline issues no redundant DMAs for them.
            return (jnp.where(active, b, 0),
                    jnp.where(active, jnp.minimum(s, nt - 1), 0),
                    0)
        return pl.BlockSpec((bt, st, H), index_map)

    in_specs = [
        x_spec(0, sts[0], n_tiles[0]),
        x_spec(1, sts[1], n_tiles[1]),
        x_spec(2, sts[2], n_tiles[2]),
        # Per-head classifier weights/bias: re-fetched only when `head` changes.
        pl.BlockSpec((None, H, c_pad), lambda h, b, s: (h, 0, 0)),
        pl.BlockSpec((None, 1, c_pad), lambda h, b, s: (h, 0, 0)),
    ]
    out_specs = pl.BlockSpec((None, bt, c_pad), lambda h, b, s: (h, b, 0))

    kernel = functools.partial(_fused_heads_kernel, seq_lens=seq_lens,
                               seq_tiles=sts, n_tiles=n_tiles)

    cost = pl.CostEstimate(
        flops=sum(B * s * H for s in seq_lens) + 3 * 2 * B * H * c_pad,
        transcendentals=0,
        bytes_accessed=(sum(x.size * x.dtype.itemsize for x in xs)
                        + w_stack.size * 4 + b_stack.size * 4
                        + 3 * B * c_pad * 4),
    )

    out = pl.pallas_call(
        kernel,
        out_shape=jax.ShapeDtypeStruct((3, B, c_pad), jnp.float32),
        grid=grid,
        in_specs=in_specs,
        out_specs=out_specs,
        scratch_shapes=[pltpu.VMEM((bt, H), jnp.float32)],
        compiler_params=pltpu.CompilerParams(
            # head & batch axes parallel (keeps both v7x TensorCores busy even
            # when B yields a single batch tile); seq is the reduction axis.
            dimension_semantics=("parallel", "parallel", "arbitrary"),
            vmem_limit_bytes=vmem_limit_bytes),
        cost_estimate=cost,
    )(x_image, x_audio, x_mm, w_stack, b_stack)

    return (out[0, :, :num_classes],
            out[1, :, :num_classes],
            out[2, :, :num_classes])


def early_fusion_multiple_heads_av(x_image, x_audio, x_mm,
                                   w_image, b_image,
                                   w_audio, b_audio,
                                   w_mm, b_mm):
    """Head math of EarlyFusionWithMultipleHeadsAV.forward (inference mode).
    For repeated calls, hoist prepare_fused_head_params out and reuse it."""
    w_stack, b_stack, num_classes = prepare_fused_head_params(
        (w_image, w_audio, w_mm), (b_image, b_audio, b_mm),
        (x_image.shape[1], x_audio.shape[1], x_mm.shape[1]))
    return early_fusion_heads_av(x_image, x_audio, x_mm, w_stack, b_stack,
                                 num_classes)


def _reference(x, weight, bias):
    pooled = jnp.mean(x.astype(jnp.float32), axis=1)
    return pooled @ weight.T.astype(jnp.float32) + bias.astype(jnp.float32)


if __name__ == "__main__":
    key = jax.random.PRNGKey(0)
    ks = jax.random.split(key, 9)

    # ---- Test 1: small, module-consistent shapes ----
    B, S_IMG, S_AUD, S_MM, H, C = 2, 16, 8, 16, 32, 4
    x_image = jax.random.normal(ks[0], (B, S_IMG, H), dtype=jnp.float32)
    x_audio = jax.random.normal(ks[1], (B, S_AUD, H), dtype=jnp.float32)
    x_mm = jax.random.normal(ks[2], (B, S_MM, H), dtype=jnp.float32)

    w_image = jax.random.normal(ks[3], (C, H), dtype=jnp.float32) * 0.02
    b_image = jax.random.normal(ks[4], (C,), dtype=jnp.float32) * 0.02
    w_audio = jax.random.normal(ks[5], (C, H), dtype=jnp.float32) * 0.02
    b_audio = jax.random.normal(ks[6], (C,), dtype=jnp.float32) * 0.02
    w_mm = jax.random.normal(ks[7], (C, H), dtype=jnp.float32) * 0.02
    b_mm = jax.random.normal(ks[8], (C,), dtype=jnp.float32) * 0.02

    w_stack, b_stack, num_classes = prepare_fused_head_params(
        (w_image, w_audio, w_mm), (b_image, b_audio, b_mm),
        (S_IMG, S_AUD, S_MM))

    outs = jax.block_until_ready(early_fusion_heads_av(
        x_image, x_audio, x_mm, w_stack, b_stack, num_classes))
    refs = (_reference(x_image, w_image, b_image),
            _reference(x_audio, w_audio, b_audio),
            _reference(x_mm, w_mm, b_mm))
    for o, r in zip(outs, refs):
        assert o.shape == (B, C) and o.dtype == jnp.float32
        assert jnp.allclose(o, r, atol=1e-4, rtol=1e-4)

    # ---- Test 2: ragged seq lengths + batch tail (masked cdiv tiles) ----
    B2, S0, S1, S2 = 10, 13, 8, 20
    y_image = jax.random.normal(ks[0], (B2, S0, H), dtype=jnp.float32)
    y_audio = jax.random.normal(ks[1], (B2, S1, H), dtype=jnp.float32)
    y_mm = jax.random.normal(ks[2], (B2, S2, H), dtype=jnp.float32)
    w2, b2, nc2 = prepare_fused_head_params(
        (w_image, w_audio, w_mm), (b_image, b_audio, b_mm), (S0, S1, S2))
    outs2 = jax.block_until_ready(
        early_fusion_heads_av(y_image, y_audio, y_mm, w2, b2, nc2))
    refs2 = (_reference(y_image, w_image, b_image),
             _reference(y_audio, w_audio, b_audio),
             _reference(y_mm, w_mm, b_mm))
    for o, r in zip(outs2, refs2):
        assert o.shape == (B2, C)
        assert jnp.allclose(o, r, atol=1e-4, rtol=1e-4)

    # ---- Test 3: bf16 activations (dtype-aware sublane alignment) ----
    z_image = x_image.astype(jnp.bfloat16)
    z_audio = x_audio.astype(jnp.bfloat16)
    z_mm = x_mm.astype(jnp.bfloat16)
    outs3 = jax.block_until_ready(early_fusion_heads_av(
        z_image, z_audio, z_mm, w_stack, b_stack, num_classes))
    refs3 = (_reference(z_image, w_image, b_image),
             _reference(z_audio, w_audio, b_audio),
             _reference(z_mm, w_mm, b_mm))
    for o, r in zip(outs3, refs3):
        assert jnp.allclose(o, r, atol=2e-3, rtol=2e-3)

    print("KERNEL_OK")
</pallas_src>

<mosaic_0001>
module attributes {stable_mosaic.version = 11 : i64} {
  func.func @_fused_heads_kernel(%arg0: i32, %arg1: i32, %arg2: i32, %arg3: memref<2x16x32xf32, #tpu.memory_space<vmem>>, %arg4: memref<2x8x32xf32, #tpu.memory_space<vmem>>, %arg5: memref<2x16x32xf32, #tpu.memory_space<vmem>>, %arg6: memref<1x32x128xf32, #tpu.memory_space<vmem>>, %arg7: memref<1x1x128xf32, #tpu.memory_space<vmem>>, %arg8: memref<1x2x128xf32, #tpu.memory_space<vmem>>, %arg9: memref<2x32xf32, #tpu.memory_space<vmem>>) attributes {dimension_semantics = [#tpu.dimension_semantics<parallel>, #tpu.dimension_semantics<parallel>, #tpu.dimension_semantics<arbitrary>], iteration_bounds = array<i64: 3, 1, 1>, scalar_prefetch = 0 : i64, scratch_operands = 1 : i64, tpu.core_type = #tpu.core_type<tc>, window_params = [{transform_indices = @transform_0, window_bounds = array<i64: 2, 16, 32>}, {transform_indices = @transform_1, window_bounds = array<i64: 2, 8, 32>}, {transform_indices = @transform_2, window_bounds = array<i64: 2, 16, 32>}, {transform_indices = @transform_3, window_bounds = array<i64: 1, 32, 128>}, {transform_indices = @transform_4, window_bounds = array<i64: 1, 1, 128>}, {transform_indices = @transform_5, window_bounds = array<i64: 1, 2, 128>}]} {
    %c0_i32 = arith.constant 0 : i32
    %0 = arith.cmpi eq, %arg2, %c0_i32 : i32
    %1 = arith.extui %0 : i1 to i32
    %c0_i32_0 = arith.constant 0 : i32
    %2 = arith.cmpi ne, %1, %c0_i32_0 : i32
    scf.if %2 {
      %cst = arith.constant 0.000000e+00 : f32
      %21 = vector.broadcast %cst : f32 to vector<2x32xf32>
      %c0 = arith.constant 0 : index
      %c0_10 = arith.constant 0 : index
      %22 = vector.load %arg9[%c0, %c0_10] : memref<2x32xf32, #tpu.memory_space<vmem>>, vector<2x32xf32>
      tpu.vector_store %arg9[%c0, %c0_10], %21 {strides = array<i32>} : memref<2x32xf32, #tpu.memory_space<vmem>>, vector<2x32xf32>,
    } else {
    }
    %c0_i32_1 = arith.constant 0 : i32
    %3 = arith.cmpi eq, %arg0, %c0_i32_1 : i32
    %c1_i32 = arith.constant 1 : i32
    %4 = arith.cmpi slt, %arg2, %c1_i32 : i32
    %5 = arith.andi %3, %4 : i1
    %6 = arith.extui %5 : i1 to i32
    %c0_i32_2 = arith.constant 0 : i32
    %7 = arith.cmpi ne, %6, %c0_i32_2 : i32
    scf.if %7 {
      %c0 = arith.constant 0 : index
      %c0_10 = arith.constant 0 : index
      %c0_11 = arith.constant 0 : index
      %21 = vector.load %arg3[%c0, %c0_10, %c0_11] : memref<2x16x32xf32, #tpu.memory_space<vmem>>, vector<2x16x32xf32>
      %c0_12 = arith.constant 0 : index
      %c0_13 = arith.constant 0 : index
      %22 = vector.load %arg9[%c0_12, %c0_13] : memref<2x32xf32, #tpu.memory_space<vmem>>, vector<2x32xf32>
      %cst = arith.constant dense<0.000000e+00> : vector<2x32xf32>
      %23 = vector.multi_reduction <add>, %21, %cst [1] : vector<2x16x32xf32> to vector<2x32xf32>
      %24 = arith.addf %22, %23 : vector<2x32xf32>
      %c0_14 = arith.constant 0 : index
      %c0_15 = arith.constant 0 : index
      %25 = vector.load %arg9[%c0_14, %c0_15] : memref<2x32xf32, #tpu.memory_space<vmem>>, vector<2x32xf32>
      tpu.vector_store %arg9[%c0_14, %c0_15], %24 {strides = array<i32>} : memref<2x32xf32, #tpu.memory_space<vmem>>, vector<2x32xf32>,
    } else {
    }
    %c1_i32_3 = arith.constant 1 : i32
    %8 = arith.cmpi eq, %arg0, %c1_i32_3 : i32
    %c1_i32_4 = arith.constant 1 : i32
    %9 = arith.cmpi slt, %arg2, %c1_i32_4 : i32
    %10 = arith.andi %8, %9 : i1
    %11 = arith.extui %10 : i1 to i32
    %c0_i32_5 = arith.constant 0 : i32
    %12 = arith.cmpi ne, %11, %c0_i32_5 : i32
    scf.if %12 {
      %c0 = arith.constant 0 : index
      %c0_10 = arith.constant 0 : index
      %c0_11 = arith.constant 0 : index
      %21 = vector.load %arg4[%c0, %c0_10, %c0_11] : memref<2x8x32xf32, #tpu.memory_space<vmem>>, vector<2x8x32xf32>
      %c0_12 = arith.constant 0 : index
      %c0_13 = arith.constant 0 : index
      %22 = vector.load %arg9[%c0_12, %c0_13] : memref<2x32xf32, #tpu.memory_space<vmem>>, vector<2x32xf32>
      %cst = arith.constant dense<0.000000e+00> : vector<2x32xf32>
      %23 = vector.multi_reduction <add>, %21, %cst [1] : vector<2x8x32xf32> to vector<2x32xf32>
      %24 = arith.addf %22, %23 : vector<2x32xf32>
      %c0_14 = arith.constant 0 : index
      %c0_15 = arith.constant 0 : index
      %25 = vector.load %arg9[%c0_14, %c0_15] : memref<2x32xf32, #tpu.memory_space<vmem>>, vector<2x32xf32>
      tpu.vector_store %arg9[%c0_14, %c0_15], %24 {strides = array<i32>} : memref<2x32xf32, #tpu.memory_space<vmem>>, vector<2x32xf32>,
    } else {
    }
    %c2_i32 = arith.constant 2 : i32
    %13 = arith.cmpi eq, %arg0, %c2_i32 : i32
    %c1_i32_6 = arith.constant 1 : i32
    %14 = arith.cmpi slt, %arg2, %c1_i32_6 : i32
    %15 = arith.andi %13, %14 : i1
    %16 = arith.extui %15 : i1 to i32
    %c0_i32_7 = arith.constant 0 : i32
    %17 = arith.cmpi ne, %16, %c0_i32_7 : i32
    scf.if %17 {
      %c0 = arith.constant 0 : index
      %c0_10 = arith.constant 0 : index
      %c0_11 = arith.constant 0 : index
      %21 = vector.load %arg5[%c0, %c0_10, %c0_11] : memref<2x16x32xf32, #tpu.memory_space<vmem>>, vector<2x16x32xf32>
      %c0_12 = arith.constant 0 : index
      %c0_13 = arith.constant 0 : index
      %22 = vector.load %arg9[%c0_12, %c0_13] : memref<2x32xf32, #tpu.memory_space<vmem>>, vector<2x32xf32>
      %cst = arith.constant dense<0.000000e+00> : vector<2x32xf32>
      %23 = vector.multi_reduction <add>, %21, %cst [1] : vector<2x16x32xf32> to vector<2x32xf32>
      %24 = arith.addf %22, %23 : vector<2x32xf32>
      %c0_14 = arith.constant 0 : index
      %c0_15 = arith.constant 0 : index
      %25 = vector.load %arg9[%c0_14, %c0_15] : memref<2x32xf32, #tpu.memory_space<vmem>>, vector<2x32xf32>
      tpu.vector_store %arg9[%c0_14, %c0_15], %24 {strides = array<i32>} : memref<2x32xf32, #tpu.memory_space<vmem>>, vector<2x32xf32>,
    } else {
    }
    %c0_i32_8 = arith.constant 0 : i32
    %18 = arith.cmpi eq, %arg2, %c0_i32_8 : i32
    %19 = arith.extui %18 : i1 to i32
    %c0_i32_9 = arith.constant 0 : i32
    %20 = arith.cmpi ne, %19, %c0_i32_9 : i32
    scf.if %20 {
      %c0 = arith.constant 0 : index
      %c0_10 = arith.constant 0 : index
      %21 = vector.load %arg9[%c0, %c0_10] : memref<2x32xf32, #tpu.memory_space<vmem>>, vector<2x32xf32>
      %c0_11 = arith.constant 0 : index
      %c0_12 = arith.constant 0 : index
      %c0_13 = arith.constant 0 : index
      %22 = vector.load %arg6[%c0_11, %c0_12, %c0_13] : memref<1x32x128xf32, #tpu.memory_space<vmem>>, vector<1x32x128xf32>
      %23 = vector.shape_cast %22 : vector<1x32x128xf32> to vector<32x128xf32>
      %cst = arith.constant dense<0.000000e+00> : vector<2x128xf32>
      %24 = tpu.matmul %21, %23, %cst {dimension_numbers = #tpu.dot_dimension_numbers<[1], [0], [0], [1], [0, 0, 1, 1], [], []>} : vector<2x32xf32>, vector<32x128xf32>, vector<2x128xf32> -> vector<2x128xf32>
      %c0_14 = arith.constant 0 : index
      %c0_15 = arith.constant 0 : index
      %c0_16 = arith.constant 0 : index
      %25 = vector.load %arg7[%c0_14, %c0_15, %c0_16] : memref<1x1x128xf32, #tpu.memory_space<vmem>>, vector<1x1x128xf32>
      %26 = vector.shape_cast %25 : vector<1x1x128xf32> to vector<1x128xf32>
      %27 = vector.broadcast %26 : vector<1x128xf32> to vector<2x128xf32>
      %28 = arith.addf %24, %27 : vector<2x128xf32>
      %c0_17 = arith.constant 0 : index
      %c0_18 = arith.constant 0 : index
      %c0_19 = arith.constant 0 : index
      %29 = vector.load %arg8[%c0_17, %c0_18, %c0_19] : memref<1x2x128xf32, #tpu.memory_space<vmem>>, vector<1x2x128xf32>
      %30 = vector.shape_cast %29 : vector<1x2x128xf32> to vector<2x128xf32>
      %31 = vector.shape_cast %28 : vector<2x128xf32> to vector<1x2x128xf32>
      tpu.vector_store %arg8[%c0_17, %c0_18, %c0_19], %31 {strides = array<i32>} : memref<1x2x128xf32, #tpu.memory_space<vmem>>, vector<1x2x128xf32>,
    } else {
    }
    return
  }
  func.func @transform_0(%arg0: i32, %arg1: i32, %arg2: i32) -> (i32, i32, i32) {
    %c0_i32 = arith.constant 0 : i32
    %0 = arith.cmpi eq, %arg0, %c0_i32 : i32
    %c0_i32_0 = arith.constant 0 : i32
    %1 = arith.select %0, %arg1, %c0_i32_0 : i32
    %c0_i32_1 = arith.constant 0 : i32
    %2 = arith.minsi %arg2, %c0_i32_1 : i32
    %c0_i32_2 = arith.constant 0 : i32
    %3 = arith.select %0, %2, %c0_i32_2 : i32
    %c0_i32_3 = arith.constant 0 : i32
    %c0_i32_4 = arith.constant 0 : i32
    return %1, %3, %c0_i32_3 : i32, i32, i32
  }
  func.func @transform_1(%arg0: i32, %arg1: i32, %arg2: i32) -> (i32, i32, i32) {
    %c1_i32 = arith.constant 1 : i32
    %0 = arith.cmpi eq, %arg0, %c1_i32 : i32
    %c0_i32 = arith.constant 0 : i32
    %1 = arith.select %0, %arg1, %c0_i32 : i32
    %c0_i32_0 = arith.constant 0 : i32
    %2 = arith.minsi %arg2, %c0_i32_0 : i32
    %c0_i32_1 = arith.constant 0 : i32
    %3 = arith.select %0, %2, %c0_i32_1 : i32
    %c0_i32_2 = arith.constant 0 : i32
    %c0_i32_3 = arith.constant 0 : i32
    return %1, %3, %c0_i32_2 : i32, i32, i32
  }
  func.func @transform_2(%arg0: i32, %arg1: i32, %arg2: i32) -> (i32, i32, i32) {
    %c2_i32 = arith.constant 2 : i32
    %0 = arith.cmpi eq, %arg0, %c2_i32 : i32
    %c0_i32 = arith.constant 0 : i32
    %1 = arith.select %0, %arg1, %c0_i32 : i32
    %c0_i32_0 = arith.constant 0 : i32
    %2 = arith.minsi %arg2, %c0_i32_0 : i32
    %c0_i32_1 = arith.constant 0 : i32
    %3 = arith.select %0, %2, %c0_i32_1 : i32
    %c0_i32_2 = arith.constant 0 : i32
    %c0_i32_3 = arith.constant 0 : i32
    return %1, %3, %c0_i32_2 : i32, i32, i32
  }
  func.func @transform_3(%arg0: i32, %arg1: i32, %arg2: i32) -> (i32, i32, i32) {
    %c0_i32 = arith.constant 0 : i32
    %c0_i32_0 = arith.constant 0 : i32
    %c0_i32_1 = arith.constant 0 : i32
    return %arg0, %c0_i32, %c0_i32_0 : i32, i32, i32
  }
  func.func @transform_4(%arg0: i32, %arg1: i32, %arg2: i32) -> (i32, i32, i32) {
    %c0_i32 = arith.constant 0 : i32
    %c0_i32_0 = arith.constant 0 : i32
    %c0_i32_1 = arith.constant 0 : i32
    return %arg0, %c0_i32, %c0_i32_0 : i32, i32, i32
  }
  func.func @transform_5(%arg0: i32, %arg1: i32, %arg2: i32) -> (i32, i32, i32) {
    %c0_i32 = arith.constant 0 : i32
    %c0_i32_0 = arith.constant 0 : i32
    return %arg0, %arg1, %c0_i32 : i32, i32, i32
  }
}

</mosaic_0001>

<bundles_post_ra>
// kernel: tpu_custom_call.1
= control target key start
LH: loop header
LB: loop body
LE: loop exit
PB: predicated region body
PF: predicated region fallthrough
CT: control target
= control target key end

     0   :  { %s1480_s0 = inlined_call_operand.hbm [shape: f32[2,16,32], index: 0, kind: input, shape index: {}]   ;;  %s1481_s1 = inlined_call_operand.hbm [shape: f32[2,8,32], index: 1, kind: input, shape index: {}]   ;;  %s1482_s2 = inlined_call_operand.hbm [shape: f32[2,16,32], index: 2, kind: input, shape index: {}]   ;;  %s1483_s3 = inlined_call_operand.hbm [shape: f32[3,32,128], index: 3, kind: input, shape index: {}]   ;;  %s1484_s4 = inlined_call_operand.vmem [shape: f32[3,1,128], index: 4, kind: input, shape index: {}]   ;;  %s1485_s5 = inlined_call_operand.hbm [shape: f32[3,2,128], index: 5, kind: output, shape index: {}]  }
   0x1   :  { %1489 = sst [smem:[#allocation16_spill]] %s1480_s0 }
   0x2   :  { %10 = vsyncpa [#allocation4], 0 }
   0x3   :  { %12 = vsyncpa [#allocation4 + $0x1], 0 }
   0x4   :  { %13 = vsyncpa [#allocation7], 0 }
   0x5   :  { %15 = vsyncpa [#allocation7 + $0x1], 0 }
   0x6   :  { %16 = vsyncpa [#allocation10], 0 }
   0x7   :  { %18 = vsyncpa [#allocation10 + $0x1], 0 }
   0x8   :  { %19 = vsyncpa [#allocation5], 0 }
   0x9   :  { %21 = vsyncpa [#allocation5 + $0x1], 0  ;;  %s1231_s18 = smov 0   ;;  %s1233_s19 = smov 0  }
   0xa   :  { %s1235_s20 = smov 0   ;;  %s1237_s21 = smov 0  }
   0xb   :  { %s1239_s22 = smov 0   ;;  %s1241_s23 = smov 0  }
   0xc LB: > { %p175_p0 = scmp.eq.s32.totalorder %s1190_s23, 0  ;;  %p933_p1 = scmp.lt.s32.totalorder %s1190_s23, 3  ;;  %s1190_s23 = sphi %s1241_s23, %s27_s23   ;;  %s1186_s22 = sphi %s1239_s22, %s1508_s22   ;;  %s1182_s21 = sphi %s1237_s21, %s1507_s21   ;;  %s1178_s20 = sphi %s1235_s20, %s1506_s20   ;;  %s1174_s19 = sphi %s1233_s19, %s1505_s19   ;;  %s1170_s18 = sphi %s1231_s18, %s1504_s18  }
   0xd   : > { %s287_s24 = sand.u32 1, %s1190_s23   ;;  %s1192_s26 = smov [#allocation6]  }
   0xe   : > { %p1268_p2 = pnand %p933_p1, %p175_p0  ;;  %s304_s27 = sshll.u32 %s1192_s26, 4  ;;  %s305_s27 = int_to_ptr.vmem [resolvable:$true] %s304_s27 }
   0xf   : > { %p865_p3 = scmp.ge.s32.totalorder %s1190_s23, 1  ;;  %s1273_s28 = scalar_lea.sflag [#allocation7], %s287_s24 }
  0x10   : > { %p998_p4 = pneg %p1268_p2  ;;  %s1007_s29 = scalar_lea.vmem %s305_s27, 256 }
  0x11   : > { %p1008_p5 = scmp.ne.s32.totalorder %s305_s27, %s1007_s29  ;;  %s1014_s30 = scalar_lea.vmem %s305_s27, 512 }
  0x12   : > { %p1015_p8 = scmp.lt.s32.totalorder %s305_s27, %s305_s27  ;;  %p1016_p9 = scmp.lt.s32.totalorder %s1014_s30, %s1007_s29 }
  0x13   : > { %p1010_p6 = pnand %p1008_p5, %p998_p4 }
  0x14   : > { %p1017_p10 = por %p1016_p9, %p1015_p8 }
  0x15   : > { %p1011_p7 = pneg %p1010_p6 }
  0x17   : > { %p1018_p11 = pnand %p1017_p10, %p1011_p7 }
  0x19   : > { %1021 = shalt.err (!%p1018_p11)
}
  0x1a   : > { %s1486_s6 = smov 128   ;;  %s1487_s7 = smov 8  }
  0x1b   : > { %922 = dma.hbm_to_vmem [thread:$0]  (!%p1268_p2), %s1481_s1, 256, %s305_s27, %s1273_s28, %s1486_s6, %s1486_s6, %s1487_s7  }
  0x1c   : > { %p368_p12 = scmp.lt.s32.totalorder %s1190_s23, 4  ;;  %s1195_s11 = smov [#allocation3]  }
  0x1d   : > { %s277_s12 = sshll.u32 %s1195_s11, 4  ;;  %s278_s12 = int_to_ptr.vmem [resolvable:$true] %s277_s12 }
  0x1e   : > { %p1292_p13 = pnand %p865_p3, %p368_p12  ;;  %s1033_s13 = scalar_lea.vmem %s278_s12, 512 }
  0x1f   : > { %p1034_p5 = scmp.ne.s32.totalorder %s278_s12, %s1033_s13  ;;  %s1040_s14 = scalar_lea.vmem %s278_s12, 1024 }
  0x20   : > { %p1041_p8 = scmp.lt.s32.totalorder %s278_s12, %s278_s12  ;;  %p1042_p9 = scmp.lt.s32.totalorder %s1040_s14, %s1033_s13 }
  0x21   : > { %p1036_p6 = pnand %p1034_p5, %p998_p4 }
  0x22   : > { %p1043_p10 = por %p1042_p9, %p1041_p8 }
  0x23   : > { %p1037_p7 = pneg %p1036_p6 }
  0x25   : > { %p1044_p11 = pnand %p1043_p10, %p1037_p7 }
  0x27   : > { %1047 = shalt.err (!%p1044_p11)
}
  0x28   : > { %s1492_s0 = sld [smem:[#allocation16_spill]]  ;;  %s1196_s17 = smov [#allocation8]  }
  0x29   : > { %s333_s24 = sshll.u32 %s1196_s17, 4  ;;  %s334_s24 = int_to_ptr.vmem [resolvable:$true] %s333_s24 }
  0x2a   : > { %s1059_s26 = scalar_lea.vmem %s334_s24, 512  ;;  %s1066_s27 = scalar_lea.vmem %s334_s24, 1024 }
  0x2b   : > { %p1060_p3 = scmp.ne.s32.totalorder %s334_s24, %s1059_s26  ;;  %p1067_p6 = scmp.lt.s32.totalorder %s334_s24, %s334_s24 }
  0x2c   : > { %p1068_p7 = scmp.lt.s32.totalorder %s1066_s27, %s1059_s26 }
  0x2d   : > { %p1062_p12 = pnand %p1060_p3, %p998_p4 }
  0x2e   : > { %919 = dma.hbm_to_vmem [thread:$0]  (!%p1268_p2), %s1492_s0, 512, %s278_s12, [#allocation4], %s1486_s6, %s1486_s6, %s1487_s7  }
  0x2f   : > { %p1063_p5 = pneg %p1062_p12  ;;  %p1069_p8 = por %p1068_p7, %p1067_p6 }
  0x31   : > { %p1070_p9 = pnand %p1069_p8, %p1063_p5 }
  0x33   : > { %1073 = shalt.err (!%p1070_p9)
}
  0x34   : > { %925 = dma.hbm_to_vmem [thread:$0]  (!%p1268_p2), %s1482_s2, 512, %s334_s24, %s1273_s28, %s1486_s6, %s1486_s6, %s1487_s7  }
  0x35   : > { %s1320_s8 = sadd.s32 4294967295, %s1190_s23   ;;  %s856_s25 = sadd.s32 4294967294, %s1190_s23  }
  0x36   : > { %s46_s9 = sadd.s32 1, %s1186_s22  ;;  %s167_s11 = sadd.s32 1, %s1178_s20 }
  0x37   : > { %p48_p4 = scmp.ge.s32.totalorder %s46_s9, 3  ;;  %p174_p10 = scmp.ne.s32.totalorder %s1178_s20, %s1174_s19 }
  0x38   : > { %p180_p11 = scmp.ne.s32.totalorder %s1174_s19, %s1170_s18  ;;  %p1488_p3 = scmp.eq.s32.totalorder %s1320_s8, 0 }
  0x39   : > { %s1510_s9 = smov (%p48_p4, %s46_s9), 0  ;;  %p1334_p2 = por %p175_p0, %p174_p10 }
  0x3a   : > { %p1340_p12 = por %p1488_p3, %p180_p11  ;;  %s164_s13 = ssub.s32 %s1186_s22, %s1510_s9 }
  0x3b   : > { %p232_p5 = scmp.eq.s32.totalorder %s1320_s8, 2  ;;  %p165_p6 = scmp.eq.s32.totalorder %s164_s13, 0 }
  0x3c   : > { %p238_p7 = scmp.eq.s32.totalorder %s856_s25, 2  ;;  %s343_s15 = sand.u32 1, %s1178_s20  }
  0x3d   : > { %p1347_p8 = por %p232_p5, %p174_p10  ;;  %s862_s24 = sshll.u32 %s343_s15, 5 }
  0x3e   : > { %s1353_s16 = scalar_select %p165_p6, %s1178_s20, %s167_s11  }
  0x3f   : > { %p1355_p0 = por %p238_p7, %p180_p11  ;;  %s880_s26 = sshll.u32 %s1186_s22, 9 }
  0x40   : > { %s353_s30 = scalar_lea.hbm %s1483_s3, %s880_s26  ;;  %s347_s6 = scalar_lea.vmem [#allocation9], %s862_s24 }
  0x41   : > { %s354_s13 = sshll.u32 %s347_s6, 4  ;;  %p1367_p9 = pnand %p933_p1, %p1334_p2  ;;  %s355_s13 = int_to_ptr.vmem [resolvable:$true] %s354_s13 }
  0x42   : > { %s344_s11 = scalar_lea.sflag [#allocation10], %s343_s15  ;;  %s1087_s7 = scalar_lea.vmem %s355_s13, 512 }
  0x43   : > { %p1076_p4 = pneg %p1367_p9  ;;  %p1088_p10 = scmp.ne.s32.totalorder %s355_s13, %s1087_s7 }
  0x44   : > { %s1197_s0 = smov [#allocation9]  }
  0x45   : > { %p1090_p11 = pnand %p1088_p10, %p1076_p4  ;;  %s1092_s27 = sshll.u32 %s1197_s0, 4  ;;  %s1093_s27 = int_to_ptr.vmem [resolvable:$false] %s1092_s27 }
  0x46   : > { %s1094_s24 = scalar_lea.vmem %s1093_s27, 1024  ;;  %p1095_p6 = scmp.lt.s32.totalorder %s355_s13, %s1093_s27 }
  0x47   : > { %p1091_p5 = pneg %p1090_p11  ;;  %p1096_p7 = scmp.lt.s32.totalorder %s1094_s24, %s1087_s7 }
  0x49   : > { %p1097_p3 = por %p1096_p7, %p1095_p6 }
  0x4b   : > { %p1098_p1 = pnand %p1097_p3, %p1091_p5 }
  0x4d   : > { %1101 = shalt.err (!%p1098_p1)
}
  0x4e   : > { %s1498_s6 = smov 8   ;;  %s1499_s28 = smov 128  }
  0x4f   : > { %928 = dma.hbm_to_vmem [thread:$0]  (!%p1367_p9), %s353_s30, 512, %s355_s13, %s344_s11, %s1499_s28, %s1499_s28, %s1498_s6  }
  0x50   : > { %372 = sbr.rel (%p1292_p13) target bundleno = 373 (0x175), region = 40  ;;  %p1500_p2 = scmp.eq.s32.totalorder (!%p1292_p13), %s1320_s8, 0 }
  0x55   : > { %1153 = dma.done.wait (%p1500_p2), [#allocation4], 512   ;;  %p1501_p4 = pmov %p1500_p2 }
  0x56   : > { %s383_s0 = sand.u32 1, %s1320_s8   ;;  %p1502_p3 = pmov %p1500_p2 }
  0x57   : > { %1155 = vsyncadd (%p1501_p4), [#allocation4], 4294966784  ;;  %s384_s7 = scalar_lea.sflag [#allocation7], %s383_s0 }
  0x58   : > { %1157 = dma.done.wait (%p1502_p3), %s384_s7, 768   ;;  %p1503_p10 = pmov %p1500_p2 }
  0x59   : > { %s1390_s15 = sand.u32 1, %s1174_s19  }
  0x5a   : > { %1159 = vsyncadd (%p1503_p10), %s384_s7, 4294966528  ;;  %s869_s10 = sshll.u32 %s1390_s15, 5  ;;  %s402_s26 = scalar_lea.sflag [#allocation10], %s1390_s15 }
  0x5b   : > { %s1394_s29 = scalar_lea.vmem [#allocation9], %s869_s10 }
  0x5c   : > { %1161 = dma.done.wait (%p1340_p12), %s402_s26, 512  }
  0x5d   : > { %1163 = vsyncadd (%p1340_p12), %s402_s26, 4294966784  ;;  %s870_s8 = sshll.u32 %s1390_s15, 1  ;;  %p470_p13 = scmp.lt.s32.totalorder %s1182_s21, 2  ;;  %vm477_vm0 = vcmask 254976   ;;  %v1198_v0 = vmov 0.0  }
  0x5e   : > { %478 = vst.msk [vmem:[#allocation2] sm:$0x3] %vm477_vm0, %v1198_v0  ;;  %p479_p9 = scmp.eq.s32.totalorder %s1182_s21, 0  ;;  %s1412_s11 = scalar_lea.vmem [#allocation11], %s870_s8 }
  0x5f   : > { %s1406_s30 = scalar_select %p470_p13, %s1182_s21, 2  ;;  %v485_v1 = vld [vmem:[#allocation3] sm:$0xff] (%p479_p9)  ;;  %v486_v2 = vld [vmem:[#allocation3 + $0x8] sm:$0xff] (%p479_p9)  ;;  %v487_v3 = vld [vmem:[#allocation3 + $0x10] sm:$0xff] (%p479_p9)  ;;  %vm490_vm1 = vcmask (%p479_p9), 261120   ;;  %vm511_vm2 = vcmask (%p479_p9), 1041409  }
  0x60   : > { %484 = sbr.rel (!%p479_p9) target bundleno = 116 (0x74), region = 64  ;;  %v488_v4 = vld [vmem:[#allocation3 + $0x18] sm:$0xff] (%p479_p9)  ;;  %v491_v5 = vsel (%p479_p9), %vm490_vm1, %v485_v1, 0.0  ;;  %v492_v6 = vsel (%p479_p9), %vm490_vm1, %v486_v2, 0.0  ;;  %v500_v7 = vsel (%p479_p9), %vm490_vm1, %v487_v3, 0.0 }
  0x61   : > { %s472_s12 = scalar_lea.vmem %s1484_s4, %s1406_s30  ;;  %v493_v8 = vadd.f32 (%p479_p9), %v492_v6, %v491_v5  ;;  %v501_v9 = vsel (%p479_p9), %vm490_vm1, %v488_v4, 0.0 }
  0x62   : > { %v502_v10 = vadd.f32 (%p479_p9), %v501_v9, %v500_v7 }
  0x63   : > { %v494_v11 = vrot.slane (%p479_p9), %v493_v8, 4 }
  0x64   : > { %v503_v12 = vrot.slane (%p479_p9), %v502_v10, 4 }
  0x65   : > { %v495_v13 = vadd.f32 %v494_v11, %v493_v8  ;;  %v489_v22 = vld [vmem:[#allocation2] sm:$0x3] }
  0x66   : > { %v504_v14 = vadd.f32 %v503_v12, %v502_v10 }
  0x67   : > { %v496_v15 = vrot.slane %v495_v13, 2 }
  0x68   : > { %v505_v16 = vrot.slane %v504_v14, 2 }
  0x69   : > { %v497_v17 = vadd.f32 %v496_v15, %v495_v13 }
  0x6a   : > { %v506_v18 = vadd.f32 %v505_v16, %v504_v14 }
  0x6b   : > { %v498_v19 = vrot.slane %v497_v17, 1 }
  0x6c   : > { %v507_v20 = vrot.slane %v506_v18, 1 }
  0x6d   : > { %v499_v21 = vadd.f32 %v498_v19, %v497_v17 }
  0x6e   : > { %v508_v23 = vadd.f32 %v507_v20, %v506_v18 }
  0x70   : > { %v512_v24 = vsel %vm511_vm2, %v508_v23, %v499_v21 }
  0x71   : > { %v514_v25 = vadd.f32 %v512_v24, %v489_v22 }
  0x73   : > { %516 = vst.msk [vmem:[#allocation2] sm:$0x3] %vm477_vm0, %v514_v25 }
  0x74 PF: > { %p517_p12 = scmp.eq.s32.totalorder %s1182_s21, 1 }
  0x75   : > { %v522_v26 = vld [vmem:[#allocation6] sm:$0xff] (%p517_p12)  ;;  %v523_v27 = vld [vmem:[#allocation6 + $0x8] sm:$0xff] (%p517_p12)  ;;  %vm525_vm3 = vcmask (%p517_p12), 261120   ;;  %vm542_vm4 = vcmask (%p517_p12), 1041409  }
  0x76   : > { %521 = sbr.rel (!%p517_p12) target bundleno = 135 (0x87), region = 68  ;;  %v526_v28 = vsel (%p517_p12), %vm525_vm3, %v522_v26, 0.0  ;;  %v533_v29 = vsel (%p517_p12), %vm525_vm3, %v523_v27, 0.0 }
  0x77   : > { %v527_v30 = vrot.slane (%p517_p12), %v526_v28, 4  ;;  %v534_v31 = vrot.slane (%p517_p12), %v533_v29, 4 }
  0x79   : > { %v528_v32 = vadd.f32 (%p517_p12), %v527_v30, %v526_v28  ;;  %v535_v33 = vadd.f32 (%p517_p12), %v534_v31, %v533_v29 }
  0x7a   : > { %v524_v40 = vld [vmem:[#allocation2] sm:$0x3] (%p517_p12) }
  0x7b   : > { %v529_v34 = vrot.slane %v528_v32, 2  ;;  %v536_v35 = vrot.slane %v535_v33, 2 }
  0x7d   : > { %v530_v36 = vadd.f32 %v529_v34, %v528_v32  ;;  %v537_v37 = vadd.f32 %v536_v35, %v535_v33 }
  0x7f   : > { %v531_v38 = vrot.slane %v530_v36, 1  ;;  %v538_v39 = vrot.slane %v537_v37, 1 }
  0x81   : > { %v532_v41 = vadd.f32 %v531_v38, %v530_v36  ;;  %v539_v42 = vadd.f32 %v538_v39, %v537_v37 }
  0x83   : > { %v543_v43 = vsel %vm542_vm4, %v539_v42, %v532_v41 }
  0x84   : > { %v545_v44 = vadd.f32 %v543_v43, %v524_v40 }
  0x86   : > { %547 = vst.msk [vmem:[#allocation2] sm:$0x3] %vm477_vm0, %v545_v44 }
  0x87 PF: > { %p548_p11 = scmp.eq.s32.totalorder %s1182_s21, 2 }
  0x88   : > { %v553_v45 = vld [vmem:[#allocation8] sm:$0xff] (%p548_p11)  ;;  %v554_v46 = vld [vmem:[#allocation8 + $0x8] sm:$0xff] (%p548_p11)  ;;  %v555_v47 = vld [vmem:[#allocation8 + $0x10] sm:$0xff] (%p548_p11)  ;;  %vm558_vm5 = vcmask (%p548_p11), 261120   ;;  %vm579_vm6 = vcmask (%p548_p11), 1041409  }
  0x89   : > { %552 = sbr.rel (!%p548_p11) target bundleno = 157 (0x9d), region = 72  ;;  %v556_v48 = vld [vmem:[#allocation8 + $0x18] sm:$0xff] (%p548_p11)  ;;  %v559_v49 = vsel (%p548_p11), %vm558_vm5, %v553_v45, 0.0  ;;  %v560_v50 = vsel (%p548_p11), %vm558_vm5, %v554_v46, 0.0  ;;  %v568_v51 = vsel (%p548_p11), %vm558_vm5, %v555_v47, 0.0 }
  0x8a   : > { %v561_v52 = vadd.f32 (%p548_p11), %v560_v50, %v559_v49  ;;  %v569_v53 = vsel (%p548_p11), %vm558_vm5, %v556_v48, 0.0 }
  0x8b   : > { %v570_v54 = vadd.f32 (%p548_p11), %v569_v53, %v568_v51 }
  0x8c   : > { %v562_v55 = vrot.slane (%p548_p11), %v561_v52, 4 }
  0x8d   : > { %v571_v56 = vrot.slane (%p548_p11), %v570_v54, 4  ;;  %v557_v3 = vld [vmem:[#allocation2] sm:$0x3] (%p548_p11) }
  0x8e   : > { %v563_v57 = vadd.f32 %v562_v55, %v561_v52 }
  0x8f   : > { %v572_v58 = vadd.f32 %v571_v56, %v570_v54 }
  0x90   : > { %v564_v59 = vrot.slane %v563_v57, 2 }
  0x91   : > { %v573_v60 = vrot.slane %v572_v58, 2 }
  0x92   : > { %v565_v61 = vadd.f32 %v564_v59, %v563_v57 }
  0x93   : > { %v574_v62 = vadd.f32 %v573_v60, %v572_v58 }
  0x94   : > { %v566_v63 = vrot.slane %v565_v61, 1 }
  0x95   : > { %v575_v1 = vrot.slane %v574_v62, 1 }
  0x96   : > { %v567_v2 = vadd.f32 %v566_v63, %v565_v61 }
  0x97   : > { %v576_v4 = vadd.f32 %v575_v1, %v574_v62 }
  0x99   : > { %v580_v5 = vsel %vm579_vm6, %v576_v4, %v567_v2 }
  0x9a   : > { %v582_v6 = vadd.f32 %v580_v5, %v557_v3 }
  0x9c   : > { %584 = vst.msk [vmem:[#allocation2] sm:$0x3] %vm477_vm0, %v582_v6 }
  0x9d PF: > { %889 = vmatprep.subr.mxu0 %v1198_v0  ;;  %v592_v7 = vld [vmem:[%s1394_s29 + $0x18] sm:$0xff]  ;;  %v591_v8 = vld [vmem:[%s1394_s29 + $0x10] sm:$0xff]  ;;  %vm1199_vm7 = vmmov 0   ;;  %v590_v9 = vld [vmem:[%s1394_s29 + $0x8] sm:$0xff]  ;;  %vm600_vm8 = vcmask 261120   ;;  %s877_s6 = sshll.u32 %s1182_s21, 5 }
  0x9e   : > { %890 = vmatpush3.msra.mxu0 %v592_v7  ;;  %897 = vmatprep.mubr.msk.f32.mxu0 %vm1199_vm7, %v1198_v0  ;;  %v589_v10 = vld [vmem:[%s1394_s29] sm:$0xff]  ;;  %v874_v12 = vld [vmem:[%s472_s12] ss:$0 sm:$0xff]  ;;  %s690_s28 = sshll.u32 %s1412_s11, 4  ;;  %s1438_s10 = scalar_lea.hbm %s1485_s5, %s877_s6  ;;  %s691_s28 = int_to_ptr.vmem [resolvable:$true] %s690_s28 }
  0x9f   : > { %891 = vmatprep.subr.mxu0 %v1198_v0  ;;  %s676_s26 = scalar_lea.sflag [#allocation5], %s1390_s15  ;;  %s1102_s29 = scalar_lea.vmem %s691_s28, 32 }
  0xa0   : > { %892 = vmatpush3.msra.mxu0 %v591_v8  ;;  %p1103_p5 = scmp.ne.s32.totalorder %s691_s28, %s1102_s29  ;;  %s1200_s8 = smov [#allocation11]  }
  0xa1   : > { %893 = vmatprep.subr.mxu0 %v1198_v0  ;;  %s1106_s30 = sshll.u32 %s1200_s8, 4  ;;  %s1107_s30 = int_to_ptr.vmem [resolvable:$false] %s1106_s30 }
  0xa2   : > { %894 = vmatpush3.msra.mxu0 %v590_v9  ;;  %p1104_p6 = pnand %p1103_p5, %p1347_p8  ;;  %s1108_s21 = scalar_lea.vmem %s1107_s30, 64 }
  0xa3   : > { %v588_v11 = vld [vmem:[#allocation2] sm:$0x3]  ;;  %895 = vmatprep.subr.mxu0 %v1198_v0  ;;  %p1109_p1 = scmp.lt.s32.totalorder %s691_s28, %s1107_s30  ;;  %p1110_p2 = scmp.lt.s32.totalorder %s1108_s21, %s1102_s29 }
  0xa4   : > { %896 = vmatpush3.msra.mxu0 %v589_v10  ;;  %p1105_p7 = pneg %p1104_p6 }
  0xa5   : > { %898 = vmatmul.mubr.msk.f32.vlgmr.msra.gmra.mxu0 %vm600_vm8, %v588_v11  ;;  %p1111_p4 = por %p1110_p2, %p1109_p1 }
  0xa7   : > { %p1112_p3 = pnand %p1111_p4, %p1105_p7 }
 0x165   : > { %v670_v13 = vpop.f32.mrf.mxu0 }
 0x166   : > { %v671_v14 = vadd.f32 %v874_v12, %v670_v13 }
 0x167   : > { %v899_v15 = vpop.f32.mrf.mxu0 }
 0x168   : > { %674 = vst [vmem:[%s1412_s11] sm:$0x3] %v671_v14 }
 0x169   : > { %1115 = shalt.err (!%p1112_p3)
}
 0x16a   : > { %s1116_s13 = scalar_lea.hbm %s1438_s10, 32  ;;  %s1120_s12 = scalar_lea.hbm %s1485_s5, 96 }
 0x16b   : > { %p1117_p10 = scmp.ne.s32.totalorder %s1438_s10, %s1116_s13  ;;  %p1121_p12 = scmp.lt.s32.totalorder %s1438_s10, %s1485_s5 }
 0x16c   : > { %p1122_p11 = scmp.lt.s32.totalorder %s1120_s12, %s1116_s13 }
 0x16d   : > { %p1118_p13 = pnand %p1117_p10, %p1347_p8 }
 0x16e   : > { %p1123_p5 = por %p1122_p11, %p1121_p12 }
 0x16f   : > { %p1119_p9 = pneg %p1118_p13 }
 0x171   : > { %p1124_p6 = pnand %p1123_p5, %p1119_p9 }
 0x173   : > { %1127 = shalt.err (!%p1124_p6)
}
 0x174   : > { %914 = dma.vmem_to_hbm [thread:$0]  (%p1347_p8), %s691_s28, 32, %s1438_s10, %s676_s26  }
 0x175 PF: > { %p940_p7 = scmp.ge.s32.totalorder %s1190_s23, 2  ;;  %s702_s24 = sand.u32 1, %s1170_s18  }
 0x176   : > { %s703_s6 = scalar_lea.sflag [#allocation5], %s702_s24 }
 0x177   : > { %p930_p1 = pnand %p940_p7, %p1355_p0 }
 0x179   : > { %p931_p2 = pneg %p930_p1 }
 0x17b   : > { %1165 = dma.done.wait (%p931_p2), %s703_s6, 32  }
 0x17c   : > { %1167 = vsyncadd (%p931_p2), %s703_s6, 4294967264  ;;  %s27_s23 = sadd.s32 1, %s1190_s23   ;;  %s1504_s18 = smov %s1174_s19 }
 0x17d   : > { %p24_p4 = scmp.ge.s32.totalorder %s27_s23, 5   ;;  %s1505_s19 = smov %s1178_s20 }
 0x17e   : > { %s1506_s20 = smov %s1353_s16  ;;  %s1507_s21 = smov %s1186_s22 }
 0x17f   : > { %s1508_s22 = smov %s1510_s9  ;;  %26 = sbr.rel (!%p24_p4) target bundleno = 12 (0xc), region = 145 }
 0x184   :  { %708 = vsyncpa [#allocation4], 1 }
 0x185   :  { %710 = vsyncpa [#allocation4 + $0x1], 1 }
 0x186   :  { %711 = vsyncpa [#allocation7], 1 }
 0x187   :  { %713 = vsyncpa [#allocation7 + $0x1], 1 }
 0x188   :  { %714 = vsyncpa [#allocation10], 1 }
 0x189   :  { %716 = vsyncpa [#allocation10 + $0x1], 1 }
 0x18a   :  { %717 = vsyncpa [#allocation5], 1 }
 0x18b   :  { %719 = vsyncpa [#allocation5 + $0x1], 1 }

</bundles_post_ra>
